<compile_context>
chip_gen: v5e
topology: v5e:2x2
jax: 0.10.0
libtpu: 0.0.40
codegen_flags: <defaults>
</compile_context>

<pallas_src>
import functools

import jax
import jax.numpy as jnp
from jax.experimental import pallas as pl
from jax.experimental.pallas import tpu as pltpu


def _round_up(x, m):
    return (x + m - 1) // m * m


def _vae_kernel(
    x_ref, eps_ref,
    w_e1_ref, b_e1_ref,          # encoder Linear(input_dim, 64)
    w_e2_ref, b_e2_ref,          # encoder Linear(64, 32)
    w_ml_ref, b_ml_ref,          # fused [mu | logvar] head: Linear(32, 2*latent)
    w_d1_ref, b_d1_ref,          # decoder Linear(latent, 32)
    w_d2_ref, b_d2_ref,          # decoder Linear(32, 64)
    w_d3_ref, b_d3_ref,          # decoder Linear(64, input_dim)
    out_ref,                     # packed (TB, PACKED) = [recon | mu | logvar | 0-pad]
    *, input_dim, latent_dim,
):
    f32 = jnp.float32
    bf16 = jnp.bfloat16

    x = x_ref[...]

    # ---- encoder (bf16 MXU matmuls, f32 accumulation / elementwise) ----
    h = jnp.dot(x.astype(bf16), w_e1_ref[...], preferred_element_type=f32) + b_e1_ref[...]
    h = jnp.maximum(h, 0.0)
    h = jnp.dot(h.astype(bf16), w_e2_ref[...], preferred_element_type=f32) + b_e2_ref[...]

    # fused mu/logvar head: one MXU pass producing [mu | logvar]
    ml = jnp.dot(h.astype(bf16), w_ml_ref[...], preferred_element_type=f32) + b_ml_ref[...]
    mu = ml[:, :latent_dim]
    logvar = ml[:, latent_dim:]

    # ---- reparameterize (f32 elementwise, EUP exp) ----
    std = jnp.exp(0.5 * logvar)
    z = mu + eps_ref[...] * std

    # ---- decoder ----
    d = jnp.dot(z.astype(bf16), w_d1_ref[...], preferred_element_type=f32) + b_d1_ref[...]
    d = jnp.maximum(d, 0.0)
    d = jnp.dot(d.astype(bf16), w_d2_ref[...], preferred_element_type=f32) + b_d2_ref[...]
    d = jnp.maximum(d, 0.0)
    recon = jnp.dot(d.astype(bf16), w_d3_ref[...], preferred_element_type=f32) + b_d3_ref[...]

    # ---- pack into one lane-dense output slab (single full-width store) ----
    tb = out_ref.shape[0]
    packed_core = input_dim + 2 * latent_dim
    pad = out_ref.shape[1] - packed_core
    pieces = [recon, ml]  # ml is already [mu | logvar] adjacent on the lane axis
    if pad > 0:
        pieces.append(jnp.zeros((tb, pad), f32))
    out_ref[...] = jnp.concatenate(pieces, axis=-1).astype(out_ref.dtype)


@functools.partial(jax.jit, static_argnames=("batch_tile",))
def vae_forward(x, eps, params, *, batch_tile=512):
    """Run the VAE forward pass.

    x:      (batch, input_dim) float32
    eps:    (batch, latent_dim) float32 standard-normal noise
    params: dict of pre-transposed weights (in, out) and biases (1, out)
    Returns (reconstruction, mu, logvar), all float32.
    """
    batch, input_dim = x.shape
    latent_dim = eps.shape[1]

    # Fuse the mu / logvar heads once in the wrapper (layout plumbing, not compute).
    w_ml = jnp.concatenate([params["w_mu"], params["w_lv"]], axis=1)   # (32, 2*latent)
    b_ml = jnp.concatenate([params["b_mu"], params["b_lv"]], axis=1)   # (1, 2*latent)

    # Batch tile: multiple of 8 sublanes, capped so 2x(in+eps+out) tiles stay
    # far below the 32 MiB scoped-VMEM budget we request (safe on v5e/v6e/v7x).
    tb = _round_up(min(batch_tile, _round_up(batch, 8)), 8)
    padded = _round_up(batch, tb)
    if padded != batch:
        x = jnp.pad(x, ((0, padded - batch), (0, 0)))
        eps = jnp.pad(eps, ((0, padded - batch), (0, 0)))

    packed_core = input_dim + 2 * latent_dim
    packed_w = _round_up(packed_core, 128)          # lane-dense output width

    bf16 = jnp.bfloat16
    weights = [
        params["w_e1"].astype(bf16), params["b_e1"],
        params["w_e2"].astype(bf16), params["b_e2"],
        w_ml.astype(bf16), b_ml,
        params["w_d1"].astype(bf16), params["b_d1"],
        params["w_d2"].astype(bf16), params["b_d2"],
        params["w_d3"].astype(bf16), params["b_d3"],
    ]

    grid = (padded // tb,)

    act_specs = [
        pl.BlockSpec((tb, input_dim), lambda i: (i, 0)),      # x tile
        pl.BlockSpec((tb, latent_dim), lambda i: (i, 0)),     # eps tile
    ]
    # Weights/biases: constant index_map -> DMA'd once, resident across grid.
    weight_specs = [pl.BlockSpec(w.shape, lambda i: (0, 0)) for w in weights]

    out_spec = pl.BlockSpec((tb, packed_w), lambda i: (i, 0))
    out_shape = jax.ShapeDtypeStruct((padded, packed_w), jnp.float32)

    flops = 2 * padded * (
        input_dim * 64 + 64 * 32 + 32 * (2 * latent_dim)
        + latent_dim * 32 + 32 * 64 + 64 * input_dim
    )
    bytes_accessed = (
        x.size * 4 + eps.size * 4
        + sum(int(w.size) * w.dtype.itemsize for w in weights)
        + padded * packed_w * 4
    )

    kernel = functools.partial(_vae_kernel, input_dim=input_dim, latent_dim=latent_dim)

    packed = pl.pallas_call(
        kernel,
        out_shape=out_shape,
        grid=grid,
        in_specs=act_specs + weight_specs,
        out_specs=out_spec,
        compiler_params=pltpu.CompilerParams(
            dimension_semantics=("parallel",),          # megacore sharding on v7x
            vmem_limit_bytes=32 * 1024 * 1024,          # explicit; safe on 64 MiB v7x
        ),
        cost_estimate=pl.CostEstimate(
            flops=flops,
            transcendentals=padded * latent_dim,        # exp in reparameterize
            bytes_accessed=bytes_accessed,
        ),
    )(x, eps, *weights)

    recon = packed[:batch, :input_dim]
    mu = packed[:batch, input_dim:input_dim + latent_dim]
    logvar = packed[:batch, input_dim + latent_dim:packed_core]
    return recon, mu, logvar


def init_params(key, input_dim, latent_dim):
    """Deterministic parameter init (shapes mirror the PyTorch module).

    Weights are stored transposed as (in_features, out_features), biases as
    (1, out_features), so every layer is x @ W + b inside the kernel.
    """
    dims = {
        "e1": (input_dim, 64),
        "e2": (64, 32),
        "mu": (32, latent_dim),
        "lv": (32, latent_dim),
        "d1": (latent_dim, 32),
        "d2": (32, 64),
        "d3": (64, input_dim),
    }
    params = {}
    keys = jax.random.split(key, 2 * len(dims))
    for i, (name, (fan_in, fan_out)) in enumerate(dims.items()):
        bound = 1.0 / jnp.sqrt(fan_in)  # matches torch.nn.Linear default init range
        w = jax.random.uniform(keys[2 * i], (fan_in, fan_out), jnp.float32, -bound, bound)
        b = jax.random.uniform(keys[2 * i + 1], (1, fan_out), jnp.float32, -bound, bound)
        params[f"w_{name}"] = w
        params[f"b_{name}"] = b
    return params


if __name__ == "__main__":
    batch = 64          # small, but exercises the batch grid (4 tiles of 16)
    input_dim = 32
    latent_dim = 16
    batch_tile = 16

    root = jax.random.PRNGKey(0)
    k_x, k_eps, k_params = jax.random.split(root, 3)

    x = jax.random.normal(k_x, (batch, input_dim), jnp.float32)
    eps = jax.random.normal(k_eps, (batch, latent_dim), jnp.float32)
    params = init_params(k_params, input_dim, latent_dim)

    recon, mu, logvar = vae_forward(x, eps, params, batch_tile=batch_tile)
    jax.block_until_ready((recon, mu, logvar))

    # Pure-JAX f32 reference of the same math.  Kernel matmuls run in bf16
    # (f32 accumulation), so tolerance is loosened vs. the old pure-f32 check.
    h = jnp.maximum(x @ params["w_e1"] + params["b_e1"], 0.0)
    h = h @ params["w_e2"] + params["b_e2"]
    mu_ref = h @ params["w_mu"] + params["b_mu"]
    lv_ref = h @ params["w_lv"] + params["b_lv"]
    z_ref = mu_ref + eps * jnp.exp(0.5 * lv_ref)
    d = jnp.maximum(z_ref @ params["w_d1"] + params["b_d1"], 0.0)
    d = jnp.maximum(d @ params["w_d2"] + params["b_d2"], 0.0)
    recon_ref = d @ params["w_d3"] + params["b_d3"]

    assert recon.shape == (batch, input_dim)
    assert mu.shape == (batch, latent_dim) and logvar.shape == (batch, latent_dim)
    assert jnp.allclose(mu, mu_ref, atol=3e-2, rtol=3e-2), "mu mismatch"
    assert jnp.allclose(logvar, lv_ref, atol=3e-2, rtol=3e-2), "logvar mismatch"
    assert jnp.allclose(recon, recon_ref, atol=3e-2, rtol=3e-2), "reconstruction mismatch"

    print("KERNEL_OK")
</pallas_src>

<mosaic_0001>
module attributes {stable_mosaic.version = 11 : i64} {
  func.func @_vae_kernel(%arg0: i32, %arg1: memref<16x32xf32, #tpu.memory_space<vmem>>, %arg2: memref<16x16xf32, #tpu.memory_space<vmem>>, %arg3: memref<32x64xbf16, #tpu.memory_space<vmem>>, %arg4: memref<1x64xf32, #tpu.memory_space<vmem>>, %arg5: memref<64x32xbf16, #tpu.memory_space<vmem>>, %arg6: memref<1x32xf32, #tpu.memory_space<vmem>>, %arg7: memref<32x32xbf16, #tpu.memory_space<vmem>>, %arg8: memref<1x32xf32, #tpu.memory_space<vmem>>, %arg9: memref<16x32xbf16, #tpu.memory_space<vmem>>, %arg10: memref<1x32xf32, #tpu.memory_space<vmem>>, %arg11: memref<32x64xbf16, #tpu.memory_space<vmem>>, %arg12: memref<1x64xf32, #tpu.memory_space<vmem>>, %arg13: memref<64x32xbf16, #tpu.memory_space<vmem>>, %arg14: memref<1x32xf32, #tpu.memory_space<vmem>>, %arg15: memref<16x128xf32, #tpu.memory_space<vmem>>) attributes {dimension_semantics = [#tpu.dimension_semantics<parallel>], iteration_bounds = array<i64: 4>, scalar_prefetch = 0 : i64, scratch_operands = 0 : i64, tpu.core_type = #tpu.core_type<tc>, window_params = [{transform_indices = @transform_0, window_bounds = array<i64: 16, 32>}, {transform_indices = @transform_1, window_bounds = array<i64: 16, 16>}, {pipeline_mode = #tpu.pipeline_mode<synchronous>, transform_indices = @transform_2, window_bounds = array<i64: 32, 64>}, {pipeline_mode = #tpu.pipeline_mode<synchronous>, transform_indices = @transform_3, window_bounds = array<i64: 1, 64>}, {pipeline_mode = #tpu.pipeline_mode<synchronous>, transform_indices = @transform_4, window_bounds = array<i64: 64, 32>}, {pipeline_mode = #tpu.pipeline_mode<synchronous>, transform_indices = @transform_5, window_bounds = array<i64: 1, 32>}, {pipeline_mode = #tpu.pipeline_mode<synchronous>, transform_indices = @transform_6, window_bounds = array<i64: 32, 32>}, {pipeline_mode = #tpu.pipeline_mode<synchronous>, transform_indices = @transform_7, window_bounds = array<i64: 1, 32>}, {pipeline_mode = #tpu.pipeline_mode<synchronous>, transform_indices = @transform_8, window_bounds = array<i64: 16, 32>}, {pipeline_mode = #tpu.pipeline_mode<synchronous>, transform_indices = @transform_9, window_bounds = array<i64: 1, 32>}, {pipeline_mode = #tpu.pipeline_mode<synchronous>, transform_indices = @transform_10, window_bounds = array<i64: 32, 64>}, {pipeline_mode = #tpu.pipeline_mode<synchronous>, transform_indices = @transform_11, window_bounds = array<i64: 1, 64>}, {pipeline_mode = #tpu.pipeline_mode<synchronous>, transform_indices = @transform_12, window_bounds = array<i64: 64, 32>}, {pipeline_mode = #tpu.pipeline_mode<synchronous>, transform_indices = @transform_13, window_bounds = array<i64: 1, 32>}, {transform_indices = @transform_14, window_bounds = array<i64: 16, 128>}]} {
    %c0 = arith.constant 0 : index
    %c0_0 = arith.constant 0 : index
    %0 = vector.load %arg1[%c0, %c0_0] : memref<16x32xf32, #tpu.memory_space<vmem>>, vector<16x32xf32>
    %1 = arith.truncf %0 : vector<16x32xf32> to vector<16x32xbf16>
    %c0_1 = arith.constant 0 : index
    %c0_2 = arith.constant 0 : index
    %2 = vector.load %arg3[%c0_1, %c0_2] : memref<32x64xbf16, #tpu.memory_space<vmem>>, vector<32x64xbf16>
    %cst = arith.constant dense<0.000000e+00> : vector<16x64xf32>
    %3 = tpu.matmul %1, %2, %cst {dimension_numbers = #tpu.dot_dimension_numbers<[1], [0], [0], [1], [0, 0, 1, 1], [], []>} : vector<16x32xbf16>, vector<32x64xbf16>, vector<16x64xf32> -> vector<16x64xf32>
    %c0_3 = arith.constant 0 : index
    %c0_4 = arith.constant 0 : index
    %4 = vector.load %arg4[%c0_3, %c0_4] : memref<1x64xf32, #tpu.memory_space<vmem>>, vector<1x64xf32>
    %5 = vector.broadcast %4 : vector<1x64xf32> to vector<16x64xf32>
    %6 = arith.addf %3, %5 : vector<16x64xf32>
    %cst_5 = arith.constant 0.000000e+00 : f32
    %7 = vector.broadcast %cst_5 : f32 to vector<16x64xf32>
    %8 = arith.maximumf %6, %7 : vector<16x64xf32>
    %9 = arith.truncf %8 : vector<16x64xf32> to vector<16x64xbf16>
    %c0_6 = arith.constant 0 : index
    %c0_7 = arith.constant 0 : index
    %10 = vector.load %arg5[%c0_6, %c0_7] : memref<64x32xbf16, #tpu.memory_space<vmem>>, vector<64x32xbf16>
    %cst_8 = arith.constant dense<0.000000e+00> : vector<16x32xf32>
    %11 = tpu.matmul %9, %10, %cst_8 {dimension_numbers = #tpu.dot_dimension_numbers<[1], [0], [0], [1], [0, 0, 1, 1], [], []>} : vector<16x64xbf16>, vector<64x32xbf16>, vector<16x32xf32> -> vector<16x32xf32>
    %c0_9 = arith.constant 0 : index
    %c0_10 = arith.constant 0 : index
    %12 = vector.load %arg6[%c0_9, %c0_10] : memref<1x32xf32, #tpu.memory_space<vmem>>, vector<1x32xf32>
    %13 = vector.broadcast %12 : vector<1x32xf32> to vector<16x32xf32>
    %14 = arith.addf %11, %13 : vector<16x32xf32>
    %15 = arith.truncf %14 : vector<16x32xf32> to vector<16x32xbf16>
    %c0_11 = arith.constant 0 : index
    %c0_12 = arith.constant 0 : index
    %16 = vector.load %arg7[%c0_11, %c0_12] : memref<32x32xbf16, #tpu.memory_space<vmem>>, vector<32x32xbf16>
    %cst_13 = arith.constant dense<0.000000e+00> : vector<16x32xf32>
    %17 = tpu.matmul %15, %16, %cst_13 {dimension_numbers = #tpu.dot_dimension_numbers<[1], [0], [0], [1], [0, 0, 1, 1], [], []>} : vector<16x32xbf16>, vector<32x32xbf16>, vector<16x32xf32> -> vector<16x32xf32>
    %c0_14 = arith.constant 0 : index
    %c0_15 = arith.constant 0 : index
    %18 = vector.load %arg8[%c0_14, %c0_15] : memref<1x32xf32, #tpu.memory_space<vmem>>, vector<1x32xf32>
    %19 = vector.broadcast %18 : vector<1x32xf32> to vector<16x32xf32>
    %20 = arith.addf %17, %19 : vector<16x32xf32>
    %21 = vector.extract_strided_slice %20 {offsets = [0, 0], sizes = [16, 16], strides = [1, 1]} : vector<16x32xf32> to vector<16x16xf32>
    %22 = vector.extract_strided_slice %20 {offsets = [0, 16], sizes = [16, 16], strides = [1, 1]} : vector<16x32xf32> to vector<16x16xf32>
    %cst_16 = arith.constant 5.000000e-01 : f32
    %23 = vector.broadcast %cst_16 : f32 to vector<16x16xf32>
    %24 = arith.mulf %23, %22 : vector<16x16xf32>
    %25 = math.exp %24 : vector<16x16xf32>
    %c0_17 = arith.constant 0 : index
    %c0_18 = arith.constant 0 : index
    %26 = vector.load %arg2[%c0_17, %c0_18] : memref<16x16xf32, #tpu.memory_space<vmem>>, vector<16x16xf32>
    %27 = arith.mulf %26, %25 : vector<16x16xf32>
    %28 = arith.addf %21, %27 : vector<16x16xf32>
    %29 = arith.truncf %28 : vector<16x16xf32> to vector<16x16xbf16>
    %c0_19 = arith.constant 0 : index
    %c0_20 = arith.constant 0 : index
    %30 = vector.load %arg9[%c0_19, %c0_20] : memref<16x32xbf16, #tpu.memory_space<vmem>>, vector<16x32xbf16>
    %cst_21 = arith.constant dense<0.000000e+00> : vector<16x32xf32>
    %31 = tpu.matmul %29, %30, %cst_21 {dimension_numbers = #tpu.dot_dimension_numbers<[1], [0], [0], [1], [0, 0, 1, 1], [], []>} : vector<16x16xbf16>, vector<16x32xbf16>, vector<16x32xf32> -> vector<16x32xf32>
    %c0_22 = arith.constant 0 : index
    %c0_23 = arith.constant 0 : index
    %32 = vector.load %arg10[%c0_22, %c0_23] : memref<1x32xf32, #tpu.memory_space<vmem>>, vector<1x32xf32>
    %33 = vector.broadcast %32 : vector<1x32xf32> to vector<16x32xf32>
    %34 = arith.addf %31, %33 : vector<16x32xf32>
    %cst_24 = arith.constant 0.000000e+00 : f32
    %35 = vector.broadcast %cst_24 : f32 to vector<16x32xf32>
    %36 = arith.maximumf %34, %35 : vector<16x32xf32>
    %37 = arith.truncf %36 : vector<16x32xf32> to vector<16x32xbf16>
    %c0_25 = arith.constant 0 : index
    %c0_26 = arith.constant 0 : index
    %38 = vector.load %arg11[%c0_25, %c0_26] : memref<32x64xbf16, #tpu.memory_space<vmem>>, vector<32x64xbf16>
    %cst_27 = arith.constant dense<0.000000e+00> : vector<16x64xf32>
    %39 = tpu.matmul %37, %38, %cst_27 {dimension_numbers = #tpu.dot_dimension_numbers<[1], [0], [0], [1], [0, 0, 1, 1], [], []>} : vector<16x32xbf16>, vector<32x64xbf16>, vector<16x64xf32> -> vector<16x64xf32>
    %c0_28 = arith.constant 0 : index
    %c0_29 = arith.constant 0 : index
    %40 = vector.load %arg12[%c0_28, %c0_29] : memref<1x64xf32, #tpu.memory_space<vmem>>, vector<1x64xf32>
    %41 = vector.broadcast %40 : vector<1x64xf32> to vector<16x64xf32>
    %42 = arith.addf %39, %41 : vector<16x64xf32>
    %cst_30 = arith.constant 0.000000e+00 : f32
    %43 = vector.broadcast %cst_30 : f32 to vector<16x64xf32>
    %44 = arith.maximumf %42, %43 : vector<16x64xf32>
    %45 = arith.truncf %44 : vector<16x64xf32> to vector<16x64xbf16>
    %c0_31 = arith.constant 0 : index
    %c0_32 = arith.constant 0 : index
    %46 = vector.load %arg13[%c0_31, %c0_32] : memref<64x32xbf16, #tpu.memory_space<vmem>>, vector<64x32xbf16>
    %cst_33 = arith.constant dense<0.000000e+00> : vector<16x32xf32>
    %47 = tpu.matmul %45, %46, %cst_33 {dimension_numbers = #tpu.dot_dimension_numbers<[1], [0], [0], [1], [0, 0, 1, 1], [], []>} : vector<16x64xbf16>, vector<64x32xbf16>, vector<16x32xf32> -> vector<16x32xf32>
    %c0_34 = arith.constant 0 : index
    %c0_35 = arith.constant 0 : index
    %48 = vector.load %arg14[%c0_34, %c0_35] : memref<1x32xf32, #tpu.memory_space<vmem>>, vector<1x32xf32>
    %49 = vector.broadcast %48 : vector<1x32xf32> to vector<16x32xf32>
    %50 = arith.addf %47, %49 : vector<16x32xf32>
    %cst_36 = arith.constant 0.000000e+00 : f32
    %51 = vector.broadcast %cst_36 : f32 to vector<16x64xf32>
    %52 = tpu.concatenate %50, %20, %51 in 1 : vector<16x32xf32>, vector<16x32xf32>, vector<16x64xf32> -> vector<16x128xf32>
    %c0_37 = arith.constant 0 : index
    %c0_38 = arith.constant 0 : index
    %53 = vector.load %arg15[%c0_37, %c0_38] : memref<16x128xf32, #tpu.memory_space<vmem>>, vector<16x128xf32>
    tpu.vector_store %arg15[%c0_37, %c0_38], %52 {strides = array<i32>} : memref<16x128xf32, #tpu.memory_space<vmem>>, vector<16x128xf32>,
    return
  }
  func.func @transform_0(%arg0: i32) -> (i32, i32) {
    %c0_i32 = arith.constant 0 : i32
    %c0_i32_0 = arith.constant 0 : i32
    return %arg0, %c0_i32 : i32, i32
  }
  func.func @transform_1(%arg0: i32) -> (i32, i32) {
    %c0_i32 = arith.constant 0 : i32
    %c0_i32_0 = arith.constant 0 : i32
    return %arg0, %c0_i32 : i32, i32
  }
  func.func @transform_2(%arg0: i32) -> (i32, i32) {
    %c0_i32 = arith.constant 0 : i32
    %c0_i32_0 = arith.constant 0 : i32
    %c0_i32_1 = arith.constant 0 : i32
    return %c0_i32, %c0_i32_0 : i32, i32
  }
  func.func @transform_3(%arg0: i32) -> (i32, i32) {
    %c0_i32 = arith.constant 0 : i32
    %c0_i32_0 = arith.constant 0 : i32
    %c0_i32_1 = arith.constant 0 : i32
    return %c0_i32, %c0_i32_0 : i32, i32
  }
  func.func @transform_4(%arg0: i32) -> (i32, i32) {
    %c0_i32 = arith.constant 0 : i32
    %c0_i32_0 = arith.constant 0 : i32
    %c0_i32_1 = arith.constant 0 : i32
    return %c0_i32, %c0_i32_0 : i32, i32
  }
  func.func @transform_5(%arg0: i32) -> (i32, i32) {
    %c0_i32 = arith.constant 0 : i32
    %c0_i32_0 = arith.constant 0 : i32
    %c0_i32_1 = arith.constant 0 : i32
    return %c0_i32, %c0_i32_0 : i32, i32
  }
  func.func @transform_6(%arg0: i32) -> (i32, i32) {
    %c0_i32 = arith.constant 0 : i32
    %c0_i32_0 = arith.constant 0 : i32
    %c0_i32_1 = arith.constant 0 : i32
    return %c0_i32, %c0_i32_0 : i32, i32
  }
  func.func @transform_7(%arg0: i32) -> (i32, i32) {
    %c0_i32 = arith.constant 0 : i32
    %c0_i32_0 = arith.constant 0 : i32
    %c0_i32_1 = arith.constant 0 : i32
    return %c0_i32, %c0_i32_0 : i32, i32
  }
  func.func @transform_8(%arg0: i32) -> (i32, i32) {
    %c0_i32 = arith.constant 0 : i32
    %c0_i32_0 = arith.constant 0 : i32
    %c0_i32_1 = arith.constant 0 : i32
    return %c0_i32, %c0_i32_0 : i32, i32
  }
  func.func @transform_9(%arg0: i32) -> (i32, i32) {
    %c0_i32 = arith.constant 0 : i32
    %c0_i32_0 = arith.constant 0 : i32
    %c0_i32_1 = arith.constant 0 : i32
    return %c0_i32, %c0_i32_0 : i32, i32
  }
  func.func @transform_10(%arg0: i32) -> (i32, i32) {
    %c0_i32 = arith.constant 0 : i32
    %c0_i32_0 = arith.constant 0 : i32
    %c0_i32_1 = arith.constant 0 : i32
    return %c0_i32, %c0_i32_0 : i32, i32
  }
  func.func @transform_11(%arg0: i32) -> (i32, i32) {
    %c0_i32 = arith.constant 0 : i32
    %c0_i32_0 = arith.constant 0 : i32
    %c0_i32_1 = arith.constant 0 : i32
    return %c0_i32, %c0_i32_0 : i32, i32
  }
  func.func @transform_12(%arg0: i32) -> (i32, i32) {
    %c0_i32 = arith.constant 0 : i32
    %c0_i32_0 = arith.constant 0 : i32
    %c0_i32_1 = arith.constant 0 : i32
    return %c0_i32, %c0_i32_0 : i32, i32
  }
  func.func @transform_13(%arg0: i32) -> (i32, i32) {
    %c0_i32 = arith.constant 0 : i32
    %c0_i32_0 = arith.constant 0 : i32
    %c0_i32_1 = arith.constant 0 : i32
    return %c0_i32, %c0_i32_0 : i32, i32
  }
  func.func @transform_14(%arg0: i32) -> (i32, i32) {
    %c0_i32 = arith.constant 0 : i32
    %c0_i32_0 = arith.constant 0 : i32
    return %arg0, %c0_i32 : i32, i32
  }
}

</mosaic_0001>

<bundles_post_ra>
// kernel: vae_forward.1
= control target key start
LH: loop header
LB: loop body
LE: loop exit
PB: predicated region body
PF: predicated region fallthrough
CT: control target
= control target key end

     0   :  { %s1058_s29 = smov 0   ;;  %s1155_s0 = inlined_call_operand.vmem [shape: f32[64,32], index: 0, kind: input, shape index: {}]   ;;  %s1156_s1 = inlined_call_operand.vmem [shape: f32[64,16], index: 1, kind: input, shape index: {}]   ;;  %s1157_s2 = inlined_call_operand.vmem [shape: bf16[32,64], index: 2, kind: input, shape index: {}]   ;;  %s1158_s3 = inlined_call_operand.vmem [shape: f32[1,64], index: 3, kind: input, shape index: {}]   ;;  %s1159_s4 = inlined_call_operand.vmem [shape: bf16[64,32], index: 4, kind: input, shape index: {}]   ;;  %s1160_s5 = inlined_call_operand.vmem [shape: f32[1,32], index: 5, kind: input, shape index: {}]   ;;  %s1161_s6 = inlined_call_operand.vmem [shape: bf16[32,32], index: 6, kind: input, shape index: {}]   ;;  %s1162_s7 = inlined_call_operand.vmem [shape: f32[1,32], index: 7, kind: input, shape index: {}]   ;;  %s1163_s8 = inlined_call_operand.vmem [shape: bf16[16,32], index: 8, kind: input, shape index: {}]   ;;  %s1164_s9 = inlined_call_operand.vmem [shape: f32[1,32], index: 9, kind: input, shape index: {}]   ;;  %s1165_s10 = inlined_call_operand.vmem [shape: bf16[32,64], index: 10, kind: input, shape index: {}]   ;;  %s1166_s11 = inlined_call_operand.vmem [shape: f32[1,64], index: 11, kind: input, shape index: {}]   ;;  %s1167_s12 = inlined_call_operand.vmem [shape: bf16[64,32], index: 12, kind: input, shape index: {}]   ;;  %s1168_s13 = inlined_call_operand.vmem [shape: f32[1,32], index: 13, kind: input, shape index: {}]   ;;  %s1169_s14 = inlined_call_operand.vmem [shape: f32[64,128], index: 14, kind: output, shape index: {}]  }
   0x1 LB: > { %s859_s30 = sadd.s32 4294967295, %s979_s29   ;;  %p863_p0 = scmp.ge.s32.totalorder %s979_s29, 1  ;;  %s979_s29 = sphi %s1058_s29, %s24_s29  }
   0x2   : > { %p424_p1 = scmp.lt.s32.totalorder %s979_s29, 5 }
   0x4   : > { %p425_p2 = pnand %p863_p0, %p424_p1 }
   0x5   : > { %s864_s17 = sshll.u32 (!%p425_p2), %s859_s30, 1  ;;  %s981_s28 = smov (!%p425_p2), 32  }
   0x6   : > { %428 = sbr.rel (%p425_p2) target bundleno = 1002 (0x3ea), region = 76  ;;  %p476_p3 = scmp.lt.s32.totalorder (!%p425_p2), %s864_s17, 7 }
   0x7   : > { %s982_s30 = smov (!%p425_p2), 112  }
   0xb   : > { %v939_v0 = vld [vmem:[%s1157_s2 + $0x8] sm:$0xff]  ;;  %v938_v1 = vld [vmem:[%s1157_s2] sm:$0xff]  ;;  %s1171_s17 = smov (!%p476_p3, %s864_s17), 7  ;;  %vm517_vm0 = vcmask 261120   ;;  %v943_v5 = vld [vmem:[%s1159_s4 + $0x18] sm:$0xff]  ;;  %vm574_vm1 = vcmask 523264  }
   0xc   : > { %527 = vmatpush.bf16.msra.mxu0 %v939_v0  ;;  %s1072_s20 = sshll.u32 %s1171_s17, 3  ;;  %582 = vmatpush.bf16.msra.mxu1 %v943_v5  ;;  %v942_v6 = vld [vmem:[%s1159_s4 + $0x10] sm:$0xff]  ;;  %v941_v7 = vld [vmem:[%s1159_s4 + $0x8] sm:$0xff]  ;;  %v940_v8 = vld [vmem:[%s1159_s4] sm:$0xff]  ;;  %vm663_vm2 = vcmask 130048  }
   0xd   : > { %s479_s23 = scalar_lea.vmem %s1155_s0, %s1072_s20  ;;  %v963_v10 = vld [vmem:[%s1158_s3] ss:$0 sm:$0xff]  ;;  %v945_v17 = vld [vmem:[%s1161_s6 + $0x8] sm:$0xff]  ;;  %s485_s22 = scalar_lea.vmem %s1156_s1, %s1072_s20  ;;  %v952_v48 = vld [vmem:[%s1167_s12 + $0x18] sm:$0xff] }
   0xe   : > { %v494_v2 = vld [vmem:[%s479_s23] sm:$0xff]  ;;  %v495_v3 = vld [vmem:[%s479_s23 + $0x8] sm:$0xff]  ;;  %622 = vmatpush.bf16.msra.mxu2 %v945_v17  ;;  %v951_v57 = vld [vmem:[%s1167_s12 + $0x10] sm:$0xff]  ;;  %s491_s27 = scalar_lea.vmem %s1169_s14, %s1072_s20 }
   0xf   : > { %v496_v4 = vpack.c.bf16 %v495_v3, %v494_v2  ;;  %v944_v18 = vld [vmem:[%s1161_s6] sm:$0xff]  ;;  %v948_v37 = vld [vmem:[%s1165_s10 + $0x8] sm:$0xff] }
  0x10   : > { %528 = vmatpush.bf16.msra.mxu0 %v938_v1  ;;  %583 = vmatpush.bf16.msra.mxu1 %v942_v6  ;;  %v964_v20 = vld [vmem:[%s1160_s5] ss:$0 sm:$0xff]  ;;  %v637_v40 = vld [vmem:[%s485_s22 + $0x8] sm:$0xff] }
  0x11   : > { %v965_v25 = vld [vmem:[%s1162_s7] ss:$0 sm:$0xff]  ;;  %v950_v58 = vld [vmem:[%s1167_s12 + $0x8] sm:$0xff] }
  0x12   : > { %623 = vmatpush.bf16.msra.mxu2 %v944_v18  ;;  %v946_v36 = vld [vmem:[%s1163_s8] sm:$0xff] }
  0x13   : > { %878 = vmatmul.msk.bf16.vlgmr.msra.gmra.mxu0 %vm517_vm0, %v496_v4  ;;  %674 = vmatpush.bf16.msra.mxu3 %v946_v36  ;;  %v636_v39 = vld [vmem:[%s485_s22] sm:$0xff] }
  0x14   : > { %584 = vmatpush.bf16.msra.mxu1 %v941_v7  ;;  %v947_v47 = vld [vmem:[%s1165_s10] sm:$0xff]  ;;  %767 = vmatpush.bf16.msrb.mxu0 %v952_v48 }
  0x15   : > { %v966_v50 = vld [vmem:[%s1164_s9] ss:$0 sm:$0xff] }
  0x16   : > { %v949_v59 = vld [vmem:[%s1167_s12] sm:$0xff] }
  0x17   : > { %713 = vmatpush.bf16.msrb.mxu3 %v948_v37  ;;  %v967_v61 = vld [vmem:[%s1166_s11] ss:$0 sm:$0xff] }
  0x18   : > { %585 = vmatpush.bf16.msra.mxu1 %v940_v8  ;;  %768 = vmatpush.bf16.msrb.mxu0 %v951_v57  ;;  %v968_v4 = vld [vmem:[%s1168_s13] ss:$0 sm:$0xff] }
  0x1b   : > { %714 = vmatpush.bf16.msrb.mxu3 %v947_v47 }
  0x1c   : > { %769 = vmatpush.bf16.msrb.mxu0 %v950_v58 }
  0x20   : > { %770 = vmatpush.bf16.msrb.mxu0 %v949_v59 }
  0x90   : > { %v530_v9 = vpop.f32.mrf.mxu0 }
  0x91   : > { %v531_v11 = vadd.f32 %v963_v10, %v530_v9 }
  0x93   : > { %v535_v14 = vmax.f32 %v531_v11, 0.0 }
  0x98   : > { %v532_v12 = vpop.f32.mrf.mxu0 }
  0x99   : > { %v533_v13 = vadd.f32 %v963_v10, %v532_v12 }
  0x9b   : > { %v536_v15 = vmax.f32 %v533_v13, 0.0 }
  0x9d   : > { %v537_v16 = vpack.c.bf16 %v536_v15, %v535_v14 }
  0x9f   : > { %895 = vmatmul.msk.bf16.vlgmr.msra.gmra.mxu1 %vm574_vm1, %v537_v16 }
 0x11c   : > { %v587_v19 = vpop.f32.mrf.mxu1 }
 0x11d   : > { %v588_v22 = vadd.f32 %v964_v20, %v587_v19 }
 0x124   : > { %v589_v21 = vpop.f32.mrf.mxu1 }
 0x125   : > { %v590_v23 = vadd.f32 %v964_v20, %v589_v21 }
 0x127   : > { %v592_v24 = vpack.c.bf16 %v590_v23, %v588_v22 }
 0x129   : > { %904 = vmatmul.msk.bf16.vlgmr.msra.gmra.mxu2 %vm517_vm0, %v592_v24 }
 0x1ac   : > { %v625_v26 = vpop.f32.mrf.mxu2 }
 0x1ad   : > { %v626_v27 = vadd.f32 %v965_v25, %v625_v26 }
 0x1af   : > { %v630_v28 = vmul.f32 0.5, %v626_v27  ;;  %779 = vrot.lane.b32.xlu1 %v626_v27, %s981_s28 }
 0x1b1   : > { %v632_v29 = vmul.f32 1.442695, %v630_v28 }
 0x1b3   : > { %969 = vpow2.f32 %v632_v29 }
 0x1b4   : > { %v627_v30 = vpop.f32.mrf.mxu2 }
 0x1b5   : > { %v628_v31 = vadd.f32 %v965_v25, %v627_v30 }
 0x1b7   : > { %v631_v32 = vmul.f32 0.5, %v628_v31  ;;  %781 = vrot.lane.b32.xlu1 %v628_v31, %s981_s28 }
 0x1b9   : > { %v970_v33 = vpop.eup %969  ;;  %v634_v34 = vmul.f32 1.442695, %v631_v32 }
 0x1ba   : > { %640 = vrot.lane.b32.xlu0 %v970_v33, %s982_s30 }
 0x1bb   : > { %971 = vpow2.f32 %v634_v34 }
 0x1c1   : > { %v972_v35 = vpop.eup %971 }
 0x1c2   : > { %642 = vrot.lane.b32.xlu0 %v972_v35, %s982_s30 }
 0x221   : > { %v780_v5 = vpop.permute.xlu1 %779 }
 0x229   : > { %v782_v12 = vpop.permute.xlu1 %781 }
 0x22c   : > { %v641_v38 = vpop.permute.xlu0 %640 }
 0x22d   : > { %v646_v41 = vmul.f32 %v641_v38, %v636_v39 }
 0x22f   : > { %v648_v44 = vadd.f32 %v646_v41, %v626_v27 }
 0x234   : > { %v643_v42 = vpop.permute.xlu0 %642 }
 0x235   : > { %v647_v43 = vmul.f32 %v643_v42, %v637_v40 }
 0x237   : > { %v649_v45 = vadd.f32 %v647_v43, %v628_v31 }
 0x239   : > { %v650_v46 = vpack.c.bf16 %v649_v45, %v648_v44 }
 0x23b   : > { %909 = vmatmul.msk.bf16.vlgmr.msra.gmra.mxu3 %vm663_vm2, %v650_v46 }
 0x2be   : > { %v676_v49 = vpop.f32.mrf.mxu3 }
 0x2bf   : > { %v677_v51 = vadd.f32 %v966_v50, %v676_v49 }
 0x2c1   : > { %v681_v54 = vmax.f32 %v677_v51, 0.0 }
 0x2c6   : > { %v678_v52 = vpop.f32.mrf.mxu3 }
 0x2c7   : > { %v679_v53 = vadd.f32 %v966_v50, %v678_v52 }
 0x2c9   : > { %v682_v55 = vmax.f32 %v679_v53, 0.0 }
 0x2cb   : > { %v683_v56 = vpack.c.bf16 %v682_v55, %v681_v54 }
 0x2cd   : > { %918 = vmatmul.msk.bf16.vlgmr.msrb.gmra.mxu3 %vm517_vm0, %v683_v56 }
 0x350   : > { %v716_v60 = vpop.f32.mrf.mxu3 }
 0x351   : > { %v717_v62 = vadd.f32 %v967_v61, %v716_v60 }
 0x353   : > { %v721_v1 = vmax.f32 %v717_v62, 0.0 }
 0x358   : > { %v718_v63 = vpop.f32.mrf.mxu3 }
 0x359   : > { %v719_v0 = vadd.f32 %v967_v61, %v718_v63 }
 0x35b   : > { %v722_v2 = vmax.f32 %v719_v0, 0.0 }
 0x35d   : > { %v723_v3 = vpack.c.bf16 %v722_v2, %v721_v1 }
 0x35f   : > { %935 = vmatmul.msk.bf16.vlgmr.msrb.gmra.mxu0 %vm574_vm1, %v723_v3 }
 0x3dc   : > { %v772_v6 = vpop.f32.mrf.mxu0 }
 0x3dd   : > { %v773_v7 = vadd.f32 %v968_v4, %v772_v6 }
 0x3df   : > { %v785_v8 = vsel %vm517_vm0, %v773_v7, %v780_v5 }
 0x3e0   : > { %v787_v9 = vsel %vm574_vm1, %v785_v8, 0.0 }
 0x3e1   : > { %789 = vst [vmem:[%s491_s27] sm:$0xff] %v787_v9 }
 0x3e4   : > { %v774_v10 = vpop.f32.mrf.mxu0 }
 0x3e5   : > { %v775_v11 = vadd.f32 %v968_v4, %v774_v10 }
 0x3e7   : > { %v786_v13 = vsel %vm517_vm0, %v775_v11, %v782_v12 }
 0x3e8   : > { %v788_v14 = vsel %vm574_vm1, %v786_v13, 0.0 }
 0x3e9   : > { %790 = vst [vmem:[%s491_s27 + $0x8] sm:$0xff] %v788_v14 }
 0x3ea PF: > { %s24_s29 = sadd.s32 1, %s979_s29  }
 0x3eb   : > { %p21_p4 = scmp.ge.s32.totalorder %s24_s29, 6  }
 0x3ed   :  { %23 = sbr.rel (!%p21_p4) target bundleno = 1 (0x1), region = 109 }

</bundles_post_ra>
